<compile_context>
chip_gen: v7x
topology: tpu7x:2x2x1
jax: 0.10.0
libtpu: 0.0.40
codegen_flags: <defaults>
</compile_context>

<pallas_src>
import math

import jax
import jax.numpy as jnp
from jax.experimental import pallas as pl
from jax.experimental.pallas import tpu as pltpu


# ---------------------------------------------------------------------------
# Tuning knobs
# ---------------------------------------------------------------------------
_DMA_MIN_BYTES = 1 << 20        # below ~1 MiB total, use the single-program VMEM kernel
_TARGET_CHUNK_BYTES = 4 << 20   # aim for ~4 MiB per DMA descriptor on the large path
_MAX_CHUNKS_PER_INPUT = 8


def _even_chunks(n_rows: int, k: int):
    """Split n_rows into k nearly equal positive chunk sizes (k clamped to n_rows)."""
    if n_rows <= 0:
        return []
    k = max(1, min(k, n_rows))
    base, rem = divmod(n_rows, k)
    return [base + (1 if c < rem else 0) for c in range(k)]


# ---------------------------------------------------------------------------
# Small-input path: single-program VMEM copy kernel
# ---------------------------------------------------------------------------
def _make_cat_vmem_kernel(n1: int, n2: int, n3: int):
    def kernel(x1_ref, x2_ref, x3_ref, o_ref):
        # Static row-slab stores; offsets 2 / 5 are sublane-misaligned which
        # only costs masked stores -- irrelevant at KB scale.
        if n1 > 0:
            o_ref[pl.ds(0, n1), :] = x1_ref[...]
        if n2 > 0:
            o_ref[pl.ds(n1, n2), :] = x2_ref[...]
        if n3 > 0:
            o_ref[pl.ds(n1 + n2, n3), :] = x3_ref[...]

    return kernel


# ---------------------------------------------------------------------------
# Large-input path: HBM->HBM chunked async-DMA kernel
# ---------------------------------------------------------------------------
def _make_cat_dma_kernel(copy_plan):
    """copy_plan: list of (input_idx, src_row_start, dst_row_start, rows), all static."""

    def kernel(x1_ref, x2_ref, x3_ref, o_ref, sem):
        in_refs = (x1_ref, x2_ref, x3_ref)
        copies = []
        for s, (inp, src0, dst0, rows) in enumerate(copy_plan):
            copies.append(
                pltpu.make_async_copy(
                    in_refs[inp].at[pl.ds(src0, rows), :],
                    o_ref.at[pl.ds(dst0, rows), :],
                    sem.at[s],
                )
            )
        # Start every descriptor first so the DMA engines overlap, then wait.
        for cp in copies:
            cp.start()
        for cp in copies:
            cp.wait()

    return kernel


# ---------------------------------------------------------------------------
# Wrapper
# ---------------------------------------------------------------------------
def cat_dim0(x1, x2, x3, *, dma_min_bytes: int = _DMA_MIN_BYTES):
    """torch.cat([x1, x2, x3], dim=0) — trailing dims of all inputs must match."""
    assert x1.shape[1:] == x2.shape[1:] == x3.shape[1:]
    assert x1.dtype == x2.dtype == x3.dtype

    trailing = x1.shape[1:]
    lane = math.prod(trailing) if trailing else 1

    n1, n2, n3 = x1.shape[0], x2.shape[0], x3.shape[0]
    n_out = n1 + n2 + n3
    itemsize = jnp.dtype(x1.dtype).itemsize
    total_bytes = n_out * lane * itemsize

    # Pure data movement: read + write everything once over the HBM interface.
    cost = pl.CostEstimate(flops=0, transcendentals=0,
                           bytes_accessed=2 * total_bytes)

    # Flatten trailing dims into the lane axis (metadata-only for these dense
    # row-major inputs; see header comment re: strided views).
    x1f = x1.reshape(n1, lane)
    x2f = x2.reshape(n2, lane)
    x3f = x3.reshape(n3, lane)
    out_shape = jax.ShapeDtypeStruct((n_out, lane), x1.dtype)

    if total_bytes < dma_min_bytes:
        # --- small path: one program, whole arrays as default VMEM blocks ---
        out_flat = pl.pallas_call(
            _make_cat_vmem_kernel(n1, n2, n3),
            out_shape=out_shape,
            cost_estimate=cost,
        )(x1f, x2f, x3f)
    else:
        # --- large path: HBM->HBM chunked DMA, no VMEM staging ---
        bytes_per_row = lane * itemsize
        copy_plan = []
        dst_off = 0
        for inp, n in enumerate((n1, n2, n3)):
            want = pl.cdiv(n * bytes_per_row, _TARGET_CHUNK_BYTES) if n > 0 else 0
            src_off = 0
            for rows in _even_chunks(n, min(_MAX_CHUNKS_PER_INPUT, max(want, 1))):
                copy_plan.append((inp, src_off, dst_off + src_off, rows))
                src_off += rows
            dst_off += n
        num_copies = max(len(copy_plan), 1)

        out_flat = pl.pallas_call(
            _make_cat_dma_kernel(copy_plan),
            out_shape=out_shape,
            in_specs=[
                pl.BlockSpec(memory_space=pl.ANY),
                pl.BlockSpec(memory_space=pl.ANY),
                pl.BlockSpec(memory_space=pl.ANY),
            ],
            out_specs=pl.BlockSpec(memory_space=pl.ANY),
            scratch_shapes=[pltpu.SemaphoreType.DMA((num_copies,))],
            compiler_params=pltpu.CompilerParams(has_side_effects=True),
            cost_estimate=cost,
        )(x1f, x2f, x3f)

    return out_flat.reshape((n_out,) + trailing)


if __name__ == "__main__":
    key = jax.random.PRNGKey(0)
    k1, k2, k3 = jax.random.split(key, 3)

    # Small NCHW-shaped inputs; concat along dim=0 (batch), as in CatModel(dim=0).
    x1 = jax.random.normal(k1, (2, 4, 16, 16), dtype=jnp.float32)
    x2 = jax.random.normal(k2, (3, 4, 16, 16), dtype=jnp.float32)
    x3 = jax.random.normal(k3, (1, 4, 16, 16), dtype=jnp.float32)

    ref = jnp.concatenate([x1, x2, x3], axis=0)

    # Default dispatch: ~24 KiB total -> single-program VMEM copy kernel.
    out_small = cat_dim0(x1, x2, x3)
    jax.block_until_ready(out_small)
    assert out_small.shape == ref.shape, (out_small.shape, ref.shape)
    assert out_small.dtype == ref.dtype
    assert jnp.array_equal(out_small, ref)

    # Force the large-input path so the chunked HBM->HBM DMA kernel is also
    # exercised and verified on-device.
    out_dma = cat_dim0(x1, x2, x3, dma_min_bytes=0)
    jax.block_until_ready(out_dma)
    assert out_dma.shape == ref.shape
    assert jnp.array_equal(out_dma, ref)

    print("KERNEL_OK")
</pallas_src>

<mosaic_0001>
module attributes {stable_mosaic.version = 11 : i64} {
  func.func @kernel(%arg0: memref<2x1024xf32, #tpu.memory_space<vmem>>, %arg1: memref<3x1024xf32, #tpu.memory_space<vmem>>, %arg2: memref<1x1024xf32, #tpu.memory_space<vmem>>, %arg3: memref<6x1024xf32, #tpu.memory_space<vmem>>) attributes {dimension_semantics = [], scalar_prefetch = 0 : i64, scratch_operands = 0 : i64, tpu.core_type = #tpu.core_type<tc>} {
    %c0 = arith.constant 0 : index
    %c0_0 = arith.constant 0 : index
    %0 = vector.load %arg0[%c0, %c0_0] : memref<2x1024xf32, #tpu.memory_space<vmem>>, vector<2x1024xf32>
    %c0_1 = arith.constant 0 : index
    %c0_2 = arith.constant 0 : index
    %1 = vector.load %arg3[%c0_1, %c0_2] : memref<6x1024xf32, #tpu.memory_space<vmem>>, vector<2x1024xf32>
    tpu.vector_store %arg3[%c0_1, %c0_2], %0 {strides = array<i32>} : memref<6x1024xf32, #tpu.memory_space<vmem>>, vector<2x1024xf32>,
    %c0_3 = arith.constant 0 : index
    %c0_4 = arith.constant 0 : index
    %2 = vector.load %arg1[%c0_3, %c0_4] : memref<3x1024xf32, #tpu.memory_space<vmem>>, vector<3x1024xf32>
    %c2 = arith.constant 2 : index
    %c0_5 = arith.constant 0 : index
    %3 = vector.load %arg3[%c2, %c0_5] : memref<6x1024xf32, #tpu.memory_space<vmem>>, vector<3x1024xf32>
    tpu.vector_store %arg3[%c2, %c0_5], %2 {strides = array<i32>} : memref<6x1024xf32, #tpu.memory_space<vmem>>, vector<3x1024xf32>,
    %c0_6 = arith.constant 0 : index
    %c0_7 = arith.constant 0 : index
    %4 = vector.load %arg2[%c0_6, %c0_7] : memref<1x1024xf32, #tpu.memory_space<vmem>>, vector<1x1024xf32>
    %c5 = arith.constant 5 : index
    %c0_8 = arith.constant 0 : index
    %5 = vector.load %arg3[%c5, %c0_8] : memref<6x1024xf32, #tpu.memory_space<vmem>>, vector<1x1024xf32>
    tpu.vector_store %arg3[%c5, %c0_8], %4 {strides = array<i32>} : memref<6x1024xf32, #tpu.memory_space<vmem>>, vector<1x1024xf32>,
    return
  }
}

</mosaic_0001>

<bundles_post_ra>
// kernel: tpu_custom_call.1
= control target key start
LH: loop header
LB: loop body
LE: loop exit
PB: predicated region body
PF: predicated region fallthrough
CT: control target
= control target key end

     0   :  { %8 = vsyncpa [#allocation3], 0  ;;  %s340_s0 = inlined_call_operand.hbm [shape: f32[2,1024], index: 0, kind: input, shape index: {}]   ;;  %s341_s1 = inlined_call_operand.hbm [shape: f32[3,1024], index: 1, kind: input, shape index: {}]   ;;  %s342_s2 = inlined_call_operand.hbm [shape: f32[1,1024], index: 2, kind: input, shape index: {}]   ;;  %s343_s3 = inlined_call_operand.hbm [shape: f32[6,1024], index: 3, kind: output, shape index: {}]  }
   0x1   :  { %9 = vsyncpa [#allocation6], 0 }
   0x2   :  { %10 = vsyncpa [#allocation4], 0  ;;  %s267_s12 = smov [#allocation5]   ;;  %s268_s14 = smov [#allocation2]  }
   0x3   :  { %s27_s13 = sshll.u32 %s267_s12, 4  ;;  %s17_s15 = sshll.u32 %s268_s14, 4  ;;  %s28_s13 = int_to_ptr.vmem [resolvable:$true] %s27_s13  ;;  %s18_s15 = int_to_ptr.vmem [resolvable:$true] %s17_s15 }
   0x4   :  { %s173_s18 = scalar_lea.hbm %s341_s1, 512 }
   0x5   :  { %p174_p0 = scmp.ne.s32.totalorder %s341_s1, %s173_s18  ;;  %p177_p1 = scmp.lt.u32.totalorder %s173_s18, %s341_s1 }
   0x7   :  { %p179_p2 = pnand %p177_p1, %p174_p0 }
   0x9   :  { %182 = shalt.err (!%p179_p2)
}
   0xa   :  { %s183_s23 = scalar_lea.vmem %s28_s13, 512  ;;  %p188_p4 = scmp.lt.s32.totalorder %s28_s13, %s28_s13 }
   0xb   :  { %p184_p3 = scmp.ne.s32.totalorder %s28_s13, %s183_s23  ;;  %p189_p5 = scmp.lt.s32.totalorder %s183_s23, %s183_s23 }
   0xd   :  { %p190_p6 = por %p189_p5, %p188_p4 }
   0xf   :  { %p191_p7 = pnand %p190_p6, %p184_p3 }
  0x11   :  { %194 = shalt.err (!%p191_p7)
}
  0x12   :  { %30 = dma.hbm_to_vmem [thread:$0]  %s341_s1, 512, %s28_s13, [#allocation6]  }
  0x13   :  { %s195_s28 = scalar_lea.hbm %s340_s0, 256 }
  0x14   :  { %p196_p8 = scmp.ne.s32.totalorder %s340_s0, %s195_s28  ;;  %p199_p9 = scmp.lt.u32.totalorder %s195_s28, %s340_s0 }
  0x16   :  { %p201_p10 = pnand %p199_p9, %p196_p8 }
  0x18   :  { %204 = shalt.err (!%p201_p10)
}
  0x19   :  { %s205_s6 = scalar_lea.vmem %s18_s15, 256  ;;  %p210_p12 = scmp.lt.s32.totalorder %s18_s15, %s18_s15 }
  0x1a   :  { %p206_p11 = scmp.ne.s32.totalorder %s18_s15, %s205_s6  ;;  %p211_p13 = scmp.lt.s32.totalorder %s205_s6, %s205_s6 }
  0x1c   :  { %p212_p0 = por %p211_p13, %p210_p12 }
  0x1e   :  { %p213_p1 = pnand %p212_p0, %p206_p11 }
  0x20   :  { %216 = shalt.err (!%p213_p1)
}
  0x21   :  { %20 = dma.hbm_to_vmem [thread:$0]  %s340_s0, 256, %s18_s15, [#allocation3]  }
  0x22   :  { %s269_s8 = smov [#allocation7]   ;;  %s217_s12 = scalar_lea.hbm %s342_s2, 128 }
  0x23   :  { %s37_s9 = sshll.u32 %s269_s8, 4  ;;  %p218_p2 = scmp.ne.s32.totalorder %s342_s2, %s217_s12  ;;  %s38_s9 = int_to_ptr.vmem [resolvable:$true] %s37_s9 }
  0x24   :  { %p221_p3 = scmp.lt.u32.totalorder %s217_s12, %s342_s2 }
  0x26   :  { %p223_p4 = pnand %p221_p3, %p218_p2 }
  0x28   :  { %226 = shalt.err (!%p223_p4)
}
  0x29   :  { %s227_s18 = scalar_lea.vmem %s38_s9, 128  ;;  %p232_p6 = scmp.lt.s32.totalorder %s38_s9, %s38_s9 }
  0x2a   :  { %p228_p5 = scmp.ne.s32.totalorder %s38_s9, %s227_s18  ;;  %p233_p7 = scmp.lt.s32.totalorder %s227_s18, %s227_s18 }
  0x2c   :  { %p234_p8 = por %p233_p7, %p232_p6 }
  0x2e   :  { %p235_p9 = pnand %p234_p8, %p228_p5 }
  0x30   :  { %238 = shalt.err (!%p235_p9)
}
  0x31   :  { %40 = dma.hbm_to_vmem [thread:$0]  %s342_s2, 128, %s38_s9, [#allocation6]  }
  0x32   :  { %261 = dma.done.wait [#allocation3], 256  }
  0x33   :  { %262 = vsyncadd [#allocation3], 4294967040 }
  0x34   :  { %263 = dma.done.wait [#allocation6], 640  }
  0x35   :  { %264 = vsyncadd [#allocation6], 4294966656  ;;  %v58_v0 = vlaneseq  ;;  %v270_v1 = vmov 1983009808   ;;  %v50_v6 = vld [vmem:[#allocation2] sm:$0xff]  ;;  %v51_v7 = vld [vmem:[#allocation2 + $0x8] sm:$0xff] }
  0x36   :  { %v56_v2 = vunpack.c.l.s4 %v270_v1  ;;  %v104_v8 = vld [vmem:[#allocation5] sm:$0x77]  ;;  %160 = vst.sshfl [vmem:[#allocation8] sm:$0x3 pattern:$0x76325410] %v50_v6  ;;  %v54_v10 = vcombine.high %v50_v6, %v50_v6  ;;  %v71_v12 = vcombine.high %v51_v7, %v51_v7 }
  0x37   :  { %v59_v3 = vshrl.u32 %v58_v0, 7  ;;  %162 = vst.sshfl [vmem:[#allocation8 + $0x20] sm:$0x3 pattern:$0x76325410] %v51_v7  ;;  %v116_v15 = vrot.slane %v104_v8, 6  ;;  %v112_v16 = vcombine.high %v104_v8, %v104_v8 }
  0x38   :  { %v57_v4 = vunpack.c.0.s8 %v56_v2  ;;  %v105_v13 = vld [vmem:[#allocation5 + $0x8] sm:$0x77]  ;;  %v106_v14 = vld [vmem:[#allocation5 + $0x10] sm:$0x77]  ;;  %v107_v19 = vld [vmem:[#allocation5 + $0x18] sm:$0x77] }
  0x39   :  { %v118_v17 = vrot.slane %v105_v13, 6  ;;  %v113_v18 = vcombine.high %v105_v13, %v105_v13  ;;  %v140_v20 = vld [vmem:[#allocation7] sm:$0xff]  ;;  %161 = vst.sshfl [vmem:[#allocation8 + $0x10] sm:$0x3 pattern:$0x76325410] %v54_v10  ;;  %v114_v28 = vcombine.high %v106_v14, %v106_v14  ;;  %v115_v32 = vcombine.high %v107_v19, %v107_v19 }
  0x3a   :  { %v60_v5 = vsub.s32 %v57_v4, %v59_v3  ;;  %163 = vst.sshfl [vmem:[#allocation8 + $0x30] sm:$0x3 pattern:$0x76325410] %v71_v12  ;;  %132 = vst [vmem:[#allocation8] sm:$0x1c] %v116_v15 }
  0x3b   :  { %142 = vst [vmem:[#allocation8 + $0x5] ss:$8 sm:$0xf] %v140_v20  ;;  %143 = vst [vmem:[#allocation8 + $0x5] ss:$8 sm:$0xf0] %v140_v20 }
  0x3c   :  { %v61_v9 = vrot.slane %v50_v6, %v60_v5  ;;  %v78_v11 = vrot.slane %v51_v7, %v60_v5  ;;  %v68_v22 = vrot.slane %v54_v10, %v60_v5  ;;  %v85_v24 = vrot.slane %v71_v12, %v60_v5  ;;  %134 = vst [vmem:[#allocation8 + $0x10] sm:$0x1c] %v118_v17  ;;  %s271_s2 = smov [#allocation8]  }
  0x3d   :  { %v117_v25 = vrot.slane %v112_v16, 6  ;;  %v119_v26 = vrot.slane %v113_v18, 6  ;;  %v120_v27 = vrot.slane %v106_v14, 6  ;;  %s150_s19 = sshll.u32 %s271_s2, 4  ;;  %v122_v31 = vrot.slane %v107_v19, 6  ;;  %s151_s19 = int_to_ptr.vmem [resolvable:$true] %s150_s19 }
  0x3e   :  { %v69_v21 = vcombine.high %v61_v9, %v61_v9  ;;  %v86_v23 = vcombine.high %v78_v11, %v78_v11  ;;  %v70_v29 = vcombine.high %v68_v22, %v68_v22  ;;  %v87_v30 = vcombine.high %v85_v24, %v85_v24  ;;  %s239_s20 = scalar_lea.vmem %s151_s19, 1024  ;;  %p244_p11 = scmp.lt.s32.totalorder %s151_s19, %s151_s19 }
  0x3f   :  { %133 = vst [vmem:[#allocation8 + $0x8] sm:$0x1c] %v117_v25  ;;  %135 = vst [vmem:[#allocation8 + $0x18] sm:$0x1c] %v119_v26  ;;  %v121_v33 = vrot.slane %v114_v28, 6  ;;  %v123_v34 = vrot.slane %v115_v32, 6  ;;  %p240_p10 = scmp.ne.s32.totalorder %s151_s19, %s239_s20  ;;  %p245_p12 = scmp.lt.s32.totalorder %s239_s20, %s239_s20 }
  0x40   :  { %97 = vst [vmem:[#allocation8 + $0x8] sm:$0x3] %v69_v21  ;;  %101 = vst [vmem:[#allocation8 + $0x28] sm:$0x3] %v86_v23 }
  0x41   :  { %136 = vst [vmem:[#allocation8 + $0x20] sm:$0x1c] %v120_v27  ;;  %99 = vst [vmem:[#allocation8 + $0x18] sm:$0x3] %v70_v29  ;;  %p246_p13 = por %p245_p12, %p244_p11 }
  0x42   :  { %103 = vst [vmem:[#allocation8 + $0x38] sm:$0x3] %v87_v30  ;;  %138 = vst [vmem:[#allocation8 + $0x30] sm:$0x1c] %v122_v31 }
  0x43   :  { %137 = vst [vmem:[#allocation8 + $0x28] sm:$0x1c] %v121_v33  ;;  %139 = vst [vmem:[#allocation8 + $0x38] sm:$0x1c] %v123_v34  ;;  %p247_p0 = pnand %p246_p13, %p240_p10 }
  0x45   :  { %250 = shalt.err (!%p247_p0)
}
  0x46   :  { %s251_s23 = scalar_lea.hbm %s343_s3, 1024 }
  0x47   :  { %p252_p1 = scmp.ne.s32.totalorder %s343_s3, %s251_s23  ;;  %p255_p2 = scmp.lt.u32.totalorder %s251_s23, %s343_s3 }
  0x49   :  { %p257_p3 = pnand %p255_p2, %p252_p1 }
  0x4b   :  { %260 = shalt.err (!%p257_p3)
}
  0x4c   :  { %153 = dma.vmem_to_hbm [thread:$0]  %s151_s19, 1024, %s343_s3, [#allocation4]  }
  0x4d   :  { %265 = dma.done.wait [#allocation4], 1024  }
  0x4e   :  { %266 = vsyncadd [#allocation4], 4294966272 }
  0x4f   :  { %157 = vsyncpa [#allocation3], 1 }
  0x50   :  { %158 = vsyncpa [#allocation6], 1 }
  0x51   :  { %159 = vsyncpa [#allocation4], 1 }

</bundles_post_ra>
